<compile_context>
chip_gen: v6e
topology: v6e:2x2x1
jax: 0.10.0
libtpu: 0.0.40
codegen_flags: <defaults>
</compile_context>

<pallas_src>
import functools

import jax
import jax.numpy as jnp
from jax.experimental import pallas as pl
from jax.experimental.pallas import tpu as pltpu


_VMEM_LIMIT_BYTES = 32 * 1024 * 1024   # safe on v7x (64 MiB physical per TC)


def _round_up(x, m):
    return (x + m - 1) // m * m


def _device_kind():
    try:
        return jax.devices()[0].device_kind.lower()
    except Exception:
        return ""


def _default_num_parts():
    # 2 TensorCores per chip only on v7x; on 1-TC v5e/v6e a second "part" is
    # just a serial outer loop with extra writeback, so keep it at 1 there.
    return 2 if "v7" in _device_kind() else 1


def _is_v5e():
    k = _device_kind()
    return ("v5e" in k) or ("v5 lite" in k) or ("v5litepod" in k)


def _pow_modulation(m, gamma):
    """(1 - pt) ** gamma, specialized to a multiply chain for integer gamma."""
    g = float(gamma)
    if g.is_integer() and g >= 0:
        g = int(g)
        if g == 0:
            return jnp.ones_like(m)
        out = m
        for _ in range(g - 1):
            out = out * m
        return out
    # Generic pow lowers to exp(gamma*log(m)); clamp tiny negative rounding.
    return jnp.maximum(m, 0.0) ** gamma


# ----------------------------------------------------------------------------
# Kernels
# ----------------------------------------------------------------------------
def _binary_focal_kernel(x_ref, t_ref, out_ref, acc_ref, *, alpha, gamma, eps,
                         total_elems, tile_rows, lanes, steps_per_part):
    p = pl.program_id(0)
    i = pl.program_id(1)

    @pl.when(i == 0)
    def _():
        acc_ref[...] = jnp.zeros_like(acc_ref)

    x = x_ref[...].astype(jnp.float32)
    t = t_ref[...].astype(jnp.float32)

    # Numerically stable sigmoid with one EUP exp + one approximate EUP
    # reciprocal (refined by two Newton steps on the VPU, which has slack)
    # instead of the library sigmoid's full-precision divide.
    e = jnp.exp(-jnp.abs(x))                     # in (0, 1], never overflows
    d = 1.0 + e
    inv = pl.reciprocal(d, approx=True)
    inv = inv * (2.0 - d * inv)                  # Newton refinement (VPU)
    inv = inv * (2.0 - d * inv)
    s = e * inv
    pos = x >= 0.0
    prob = jnp.where(pos, inv, s)                # sigmoid(x)
    one_m_prob = jnp.where(pos, s, inv)          # sigmoid(-x) == 1 - prob

    # Interpolation form keeps soft-label support (matches the reference).
    pt = prob * t + one_m_prob * (1.0 - t)
    log_pt = jnp.log(pt + eps)
    loss = (-alpha) * _pow_modulation(1.0 - pt, gamma) * log_pt

    def _fold(v):
        # Collapse the tile into a small (8, lanes) running sum (VPU adds over
        # sublane groups); cross-lane reduction happens once per part at the end.
        if tile_rows > 8 and tile_rows % 8 == 0:
            return v.reshape(tile_rows // 8, 8, lanes).sum(axis=0)
        return v

    tile_elems = tile_rows * lanes
    tile_idx = p * steps_per_part + i
    tile_start = tile_idx * tile_elems
    needs_mask = tile_start + tile_elems > total_elems   # only the ragged tail

    @pl.when(jnp.logical_not(needs_mask))
    def _():
        acc_ref[...] += _fold(loss)

    @pl.when(needs_mask)
    def _():
        row_ids = jax.lax.broadcasted_iota(jnp.int32, (tile_rows, lanes), 0)
        lane_ids = jax.lax.broadcasted_iota(jnp.int32, (tile_rows, lanes), 1)
        flat_idx = tile_start + row_ids * lanes + lane_ids
        acc_ref[...] += _fold(jnp.where(flat_idx < total_elems, loss, 0.0))

    @pl.when(i == steps_per_part - 1)
    def _():
        out_ref[...] = jnp.zeros((1, 1, 1), jnp.float32) + jnp.sum(acc_ref[...])


def _multiclass_focal_kernel(x_ref, t_ref, out_ref, acc_ref, *, alpha, gamma,
                             eps, n_valid, tile_n, steps_per_part):
    p = pl.program_id(0)
    i = pl.program_id(1)

    @pl.when(i == 0)
    def _():
        acc_ref[...] = jnp.zeros_like(acc_ref)

    x = x_ref[...].astype(jnp.float32)            # (C, TN): classes on sublanes
    tgt = t_ref[...]                              # (1, TN): samples on lanes

    # Softmax statistics over the (small) class axis; samples stay lane-dense.
    x_max = jnp.max(x, axis=0, keepdims=True)                     # (1, TN)
    shifted = x - x_max
    sum_exp = jnp.sum(jnp.exp(shifted), axis=0, keepdims=True)    # (1, TN)

    class_ids = jax.lax.broadcasted_iota(jnp.int32, x.shape, 0)   # (C, TN)
    onehot = (class_ids == tgt).astype(jnp.float32)
    x_t = jnp.sum(shifted * onehot, axis=0, keepdims=True)        # (1, TN)

    # Log-softmax formulation: no per-element divide.
    log_pt_raw = x_t - jnp.log(sum_exp)
    pt = jnp.exp(log_pt_raw)                      # softmax prob of target class
    log_pt = jnp.log(pt + eps)                    # keep reference eps semantics
    loss = (-alpha) * _pow_modulation(1.0 - pt, gamma) * log_pt   # (1, TN)

    tile_idx = p * steps_per_part + i
    col_start = tile_idx * tile_n
    needs_mask = col_start + tile_n > n_valid     # only the ragged tail tile

    @pl.when(jnp.logical_not(needs_mask))
    def _():
        acc_ref[...] += loss

    @pl.when(needs_mask)
    def _():
        col_ids = col_start + jax.lax.broadcasted_iota(jnp.int32, (1, tile_n), 1)
        acc_ref[...] += jnp.where(col_ids < n_valid, loss, 0.0)

    @pl.when(i == steps_per_part - 1)
    def _():
        out_ref[...] = jnp.zeros((1, 1, 1), jnp.float32) + jnp.sum(acc_ref[...])


# ----------------------------------------------------------------------------
# Wrappers (plain-JAX glue: zero-copy views / pallas_call setup; NO padding)
# ----------------------------------------------------------------------------
def focal_loss_binary(logits, target, *, alpha=0.25, gamma=2, eps=1e-5,
                      max_tile_rows=1024, num_parts=None):
    """num_class is None / 1 path: sigmoid focal loss, elementwise target."""
    x = jnp.asarray(logits)
    t = jnp.asarray(target)
    if not jnp.issubdtype(t.dtype, jnp.floating):
        t = t.astype(jnp.float32)
    total = int(x.size)
    if num_parts is None:
        num_parts = _default_num_parts()

    # Zero-copy 2-D views only.  (jnp.pad before a pallas_call would force XLA
    # to materialize a full extra HBM copy of both inputs.)
    lanes = None
    for cand in (512, 256, 128):
        if total % cand == 0:
            lanes = cand
            break
    if lanes is not None:
        rows = total // lanes
        xv = x.reshape(rows, lanes)
        tv = t.reshape(rows, lanes)
        tile_rows = min(max_tile_rows, _round_up(rows, 8))
        if tile_rows > rows:          # tiny input: one exact full-extent block
            tile_rows = rows
        tile_axis = 0
        total_tiles = pl.cdiv(rows, tile_rows)
    else:
        # Ragged size (not a multiple of 128): single-row view tiled along
        # lanes; still zero-copy, the partial last block is masked in-kernel.
        xv = x.reshape(1, total)
        tv = t.reshape(1, total)
        tile_rows = 1
        lanes = min(64 * 1024, _round_up(total, 128))
        tile_axis = 1
        total_tiles = pl.cdiv(total, lanes)

    num_parts = max(1, min(num_parts, total_tiles))
    steps_per_part = pl.cdiv(total_tiles, num_parts)
    last_tile = total_tiles - 1

    # Clamp the block index so phantom steps of the last part re-read the last
    # real block (DMA stays in bounds); the in-kernel mask zeroes them out.
    if tile_axis == 0:
        def in_map(p, i, s=steps_per_part, last=last_tile):
            return (jnp.minimum(p * s + i, last), 0)
    else:
        def in_map(p, i, s=steps_per_part, last=last_tile):
            return (0, jnp.minimum(p * s + i, last))

    acc_rows = 8 if tile_rows % 8 == 0 else tile_rows

    kernel = functools.partial(
        _binary_focal_kernel, alpha=float(alpha), gamma=gamma, eps=float(eps),
        total_elems=total, tile_rows=tile_rows, lanes=lanes,
        steps_per_part=steps_per_part)

    # v5e is the lowest-bandwidth chip and this is a pure streaming read: a
    # third pipeline buffer hides DMA issue jitter there (marginal elsewhere).
    spec_kw = {"pipeline_mode": pl.Buffered(3)} if _is_v5e() else {}

    out = pl.pallas_call(
        kernel,
        out_shape=jax.ShapeDtypeStruct((num_parts, 1, 1), jnp.float32),
        grid_spec=pltpu.PrefetchScalarGridSpec(
            num_scalar_prefetch=0,
            grid=(num_parts, steps_per_part),
            in_specs=[
                pl.BlockSpec((tile_rows, lanes), in_map, **spec_kw),
                pl.BlockSpec((tile_rows, lanes), in_map, **spec_kw),
            ],
            out_specs=pl.BlockSpec((1, 1, 1), lambda p, i: (p, 0, 0)),
            scratch_shapes=[pltpu.VMEM((acc_rows, lanes), jnp.float32)],
        ),
        compiler_params=pltpu.CompilerParams(
            dimension_semantics=("parallel", "arbitrary"),
            vmem_limit_bytes=_VMEM_LIMIT_BYTES),
    )(xv, tv)
    return jnp.sum(out)


def focal_loss_multiclass(logits, target, *, num_class, alpha=0.25, gamma=2,
                          eps=1e-5, max_tile_n=8192, num_parts=None):
    """num_class > 1 path: softmax + one-hot focal loss; target is int class id."""
    x = jnp.asarray(logits).reshape(-1, num_class)          # (N, C), zero-copy
    n = int(x.shape[0])
    if num_parts is None:
        num_parts = _default_num_parts()

    # One-time layout plumbing: put the sample axis on TPU lanes so the
    # per-sample exp/log/pow chain and the accumulator run lane-dense
    # (a (N, C) block at C=10 uses only 10 of 128 lanes in every vreg).
    # TODO(synk): for num_class >> 128 a direct (N, C) kernel would avoid this
    # transpose; focal loss is typically used with small class counts.
    xt = jnp.transpose(x)                                    # (C, N)
    tgt = jnp.asarray(target, jnp.int32).reshape(1, -1)      # (1, N), lane-dense

    # Lane-tile budget accounting for sublane padding of C and double buffering.
    c_sub = _round_up(num_class, 8)
    bytes_per_col = 2 * (c_sub * xt.dtype.itemsize + 4) + c_sub * 4 + 4
    budget = 8 * 1024 * 1024
    tile_n = max(128, min(max_tile_n, (budget // bytes_per_col) // 128 * 128))
    tile_n = min(tile_n, _round_up(n, 128))

    total_tiles = pl.cdiv(n, tile_n)
    num_parts = max(1, min(num_parts, total_tiles))
    steps_per_part = pl.cdiv(total_tiles, num_parts)
    last_tile = total_tiles - 1

    def col_map(p, i, s=steps_per_part, last=last_tile):
        return (0, jnp.minimum(p * s + i, last))

    kernel = functools.partial(
        _multiclass_focal_kernel, alpha=float(alpha), gamma=gamma,
        eps=float(eps), n_valid=n, tile_n=tile_n, steps_per_part=steps_per_part)

    out = pl.pallas_call(
        kernel,
        out_shape=jax.ShapeDtypeStruct((num_parts, 1, 1), jnp.float32),
        grid_spec=pltpu.PrefetchScalarGridSpec(
            num_scalar_prefetch=0,
            grid=(num_parts, steps_per_part),
            in_specs=[
                pl.BlockSpec((num_class, tile_n), col_map),
                pl.BlockSpec((1, tile_n), col_map),
            ],
            out_specs=pl.BlockSpec((1, 1, 1), lambda p, i: (p, 0, 0)),
            scratch_shapes=[pltpu.VMEM((1, tile_n), jnp.float32)],
        ),
        compiler_params=pltpu.CompilerParams(
            dimension_semantics=("parallel", "arbitrary"),
            vmem_limit_bytes=_VMEM_LIMIT_BYTES),
    )(xt, tgt)
    return jnp.sum(out)


class FocalLoss:
    """Mirror of the PyTorch module's forward()."""

    def __init__(self, alpha=0.25, gamma=2, num_class=None, eps=1e-5):
        self.alpha, self.gamma, self.num_class, self.eps = alpha, gamma, num_class, eps

    def __call__(self, logits, target):
        if self.num_class is None or self.num_class == 1:
            return focal_loss_binary(logits, target, alpha=self.alpha,
                                     gamma=self.gamma, eps=self.eps)
        return focal_loss_multiclass(logits, target, num_class=self.num_class,
                                     alpha=self.alpha, gamma=self.gamma,
                                     eps=self.eps)


# ----------------------------------------------------------------------------
# Pure-JAX references (correctness check)
# ----------------------------------------------------------------------------
def _ref_binary(logits, target, alpha=0.25, gamma=2, eps=1e-5):
    prob = jax.nn.sigmoid(logits.astype(jnp.float32))
    t = target.astype(jnp.float32)
    pt = prob * t + (1 - prob) * (1 - t)
    log_pt = jnp.log(pt + eps)
    return jnp.sum(-alpha * (1 - pt) ** gamma * log_pt)


def _ref_multiclass(logits, target, num_class, alpha=0.25, gamma=2, eps=1e-5):
    prob = jax.nn.softmax(logits.astype(jnp.float32), axis=-1)
    oh = jax.nn.one_hot(target, num_class, dtype=jnp.float32)
    pt = jnp.sum(prob * oh, axis=-1)
    log_pt = jnp.log(pt + eps)
    return jnp.sum(-alpha * (1 - pt) ** gamma * log_pt)


# ----------------------------------------------------------------------------
if __name__ == "__main__":
    key = jax.random.PRNGKey(0)
    k1, k2, k3, k4 = jax.random.split(key, 4)

    # ---- binary / sigmoid path (num_class=None), NCHW-like input ----
    x_bin = jax.random.normal(k1, (2, 4, 16, 16), dtype=jnp.float32)
    t_bin = (jax.random.uniform(k2, (2, 4, 16, 16)) > 0.5).astype(jnp.float32)
    loss_bin = jax.block_until_ready(FocalLoss(num_class=None)(x_bin, t_bin))
    ref_bin = _ref_binary(x_bin, t_bin)
    assert jnp.allclose(loss_bin, ref_bin, rtol=2e-4, atol=2e-4), (loss_bin, ref_bin)

    # ---- multi-class / softmax path (num_class=10) ----
    num_class = 10
    x_mc = jax.random.normal(k3, (16, num_class), dtype=jnp.float32)
    t_mc = jax.random.randint(k4, (16,), 0, num_class, dtype=jnp.int32)
    loss_mc = jax.block_until_ready(FocalLoss(num_class=num_class)(x_mc, t_mc))
    ref_mc = _ref_multiclass(x_mc, t_mc, num_class)
    assert jnp.allclose(loss_mc, ref_mc, rtol=2e-4, atol=2e-4), (loss_mc, ref_mc)

    print("KERNEL_OK")
</pallas_src>

<mosaic_0001>
module attributes {stable_mosaic.version = 11 : i64} {
  func.func @_binary_focal_kernel(%arg0: i32, %arg1: i32, %arg2: memref<4x512xf32, #tpu.memory_space<vmem>>, %arg3: memref<4x512xf32, #tpu.memory_space<vmem>>, %arg4: memref<1x1x1xf32, #tpu.memory_space<vmem>>, %arg5: memref<4x512xf32, #tpu.memory_space<vmem>>) attributes {dimension_semantics = [#tpu.dimension_semantics<parallel>, #tpu.dimension_semantics<arbitrary>], iteration_bounds = array<i64: 1, 1>, scalar_prefetch = 0 : i64, scratch_operands = 1 : i64, tpu.core_type = #tpu.core_type<tc>, window_params = [{transform_indices = @transform_0, window_bounds = array<i64: 4, 512>}, {transform_indices = @transform_1, window_bounds = array<i64: 4, 512>}, {transform_indices = @transform_2, window_bounds = array<i64: 1, 1, 1>}]} {
    %c0_i32 = arith.constant 0 : i32
    %0 = arith.cmpi eq, %arg1, %c0_i32 : i32
    %1 = arith.extui %0 : i1 to i32
    %c0_i32_0 = arith.constant 0 : i32
    %2 = arith.cmpi ne, %1, %c0_i32_0 : i32
    scf.if %2 {
      %cst_18 = arith.constant 0.000000e+00 : f32
      %52 = vector.broadcast %cst_18 : f32 to vector<4x512xf32>
      %c0_19 = arith.constant 0 : index
      %c0_20 = arith.constant 0 : index
      %53 = vector.load %arg5[%c0_19, %c0_20] : memref<4x512xf32, #tpu.memory_space<vmem>>, vector<4x512xf32>
      tpu.vector_store %arg5[%c0_19, %c0_20], %52 {strides = array<i32>} : memref<4x512xf32, #tpu.memory_space<vmem>>, vector<4x512xf32>,
    } else {
    }
    %c0 = arith.constant 0 : index
    %c0_1 = arith.constant 0 : index
    %3 = vector.load %arg2[%c0, %c0_1] : memref<4x512xf32, #tpu.memory_space<vmem>>, vector<4x512xf32>
    %c0_2 = arith.constant 0 : index
    %c0_3 = arith.constant 0 : index
    %4 = vector.load %arg3[%c0_2, %c0_3] : memref<4x512xf32, #tpu.memory_space<vmem>>, vector<4x512xf32>
    %5 = math.absf %3 : vector<4x512xf32>
    %cst = arith.constant 0.000000e+00 : f32
    %6 = vector.broadcast %cst : f32 to vector<4x512xf32>
    %7 = arith.subf %6, %5 : vector<4x512xf32>
    %8 = math.exp %7 : vector<4x512xf32>
    %cst_4 = arith.constant 1.000000e+00 : f32
    %9 = vector.broadcast %cst_4 : f32 to vector<4x512xf32>
    %10 = arith.addf %9, %8 : vector<4x512xf32>
    %11 = tpu.reciprocal %10 {approx = true} : vector<4x512xf32> -> vector<4x512xf32>
    %12 = arith.mulf %10, %11 : vector<4x512xf32>
    %cst_5 = arith.constant 2.000000e+00 : f32
    %13 = vector.broadcast %cst_5 : f32 to vector<4x512xf32>
    %14 = arith.subf %13, %12 : vector<4x512xf32>
    %15 = arith.mulf %11, %14 : vector<4x512xf32>
    %16 = arith.mulf %10, %15 : vector<4x512xf32>
    %cst_6 = arith.constant 2.000000e+00 : f32
    %17 = vector.broadcast %cst_6 : f32 to vector<4x512xf32>
    %18 = arith.subf %17, %16 : vector<4x512xf32>
    %19 = arith.mulf %15, %18 : vector<4x512xf32>
    %20 = arith.mulf %8, %19 : vector<4x512xf32>
    %cst_7 = arith.constant 0.000000e+00 : f32
    %21 = vector.broadcast %cst_7 : f32 to vector<4x512xf32>
    %22 = arith.cmpf oge, %3, %21 : vector<4x512xf32>
    %23 = arith.select %22, %19, %20 : vector<4x512xi1>, vector<4x512xf32>
    %24 = arith.select %22, %20, %19 : vector<4x512xi1>, vector<4x512xf32>
    %25 = arith.mulf %23, %4 : vector<4x512xf32>
    %cst_8 = arith.constant 1.000000e+00 : f32
    %26 = vector.broadcast %cst_8 : f32 to vector<4x512xf32>
    %27 = arith.subf %26, %4 : vector<4x512xf32>
    %28 = arith.mulf %24, %27 : vector<4x512xf32>
    %29 = arith.addf %25, %28 : vector<4x512xf32>
    %cst_9 = arith.constant 9.99999974E-6 : f32
    %30 = vector.broadcast %cst_9 : f32 to vector<4x512xf32>
    %31 = arith.addf %29, %30 : vector<4x512xf32>
    %32 = math.log %31 : vector<4x512xf32>
    %cst_10 = arith.constant 1.000000e+00 : f32
    %33 = vector.broadcast %cst_10 : f32 to vector<4x512xf32>
    %34 = arith.subf %33, %29 : vector<4x512xf32>
    %35 = arith.mulf %34, %34 : vector<4x512xf32>
    %cst_11 = arith.constant -2.500000e-01 : f32
    %36 = vector.broadcast %cst_11 : f32 to vector<4x512xf32>
    %37 = arith.mulf %36, %35 : vector<4x512xf32>
    %38 = arith.mulf %37, %32 : vector<4x512xf32>
    %c1_i32 = arith.constant 1 : i32
    %39 = arith.muli %arg0, %c1_i32 : i32
    %40 = arith.addi %39, %arg1 : i32
    %c2048_i32 = arith.constant 2048 : i32
    %41 = arith.muli %40, %c2048_i32 : i32
    %c2048_i32_12 = arith.constant 2048 : i32
    %42 = arith.addi %41, %c2048_i32_12 : i32
    %c2048_i32_13 = arith.constant 2048 : i32
    %43 = arith.cmpi sgt, %42, %c2048_i32_13 : i32
    %true = arith.constant true
    %44 = arith.xori %43, %true : i1
    %45 = arith.extui %44 : i1 to i32
    %c0_i32_14 = arith.constant 0 : i32
    %46 = arith.cmpi ne, %45, %c0_i32_14 : i32
    scf.if %46 {
      %c0_18 = arith.constant 0 : index
      %c0_19 = arith.constant 0 : index
      %52 = vector.load %arg5[%c0_18, %c0_19] : memref<4x512xf32, #tpu.memory_space<vmem>>, vector<4x512xf32>
      %53 = arith.addf %52, %38 : vector<4x512xf32>
      %c0_20 = arith.constant 0 : index
      %c0_21 = arith.constant 0 : index
      %54 = vector.load %arg5[%c0_20, %c0_21] : memref<4x512xf32, #tpu.memory_space<vmem>>, vector<4x512xf32>
      tpu.vector_store %arg5[%c0_20, %c0_21], %53 {strides = array<i32>} : memref<4x512xf32, #tpu.memory_space<vmem>>, vector<4x512xf32>,
    } else {
    }
    %47 = arith.extui %43 : i1 to i32
    %c0_i32_15 = arith.constant 0 : i32
    %48 = arith.cmpi ne, %47, %c0_i32_15 : i32
    scf.if %48 {
      %52 = tpu.iota {dimensions = array<i32: 0>} : vector<4x512xi32>
      %53 = tpu.iota {dimensions = array<i32: 1>} : vector<4x512xi32>
      %c512_i32 = arith.constant 512 : i32
      %54 = vector.broadcast %c512_i32 : i32 to vector<4x512xi32>
      %55 = arith.muli %52, %54 : vector<4x512xi32>
      %56 = vector.broadcast %41 : i32 to vector<4x512xi32>
      %57 = arith.addi %56, %55 : vector<4x512xi32>
      %58 = arith.addi %57, %53 : vector<4x512xi32>
      %c0_18 = arith.constant 0 : index
      %c0_19 = arith.constant 0 : index
      %59 = vector.load %arg5[%c0_18, %c0_19] : memref<4x512xf32, #tpu.memory_space<vmem>>, vector<4x512xf32>
      %c2048_i32_20 = arith.constant 2048 : i32
      %60 = vector.broadcast %c2048_i32_20 : i32 to vector<4x512xi32>
      %61 = arith.cmpi slt, %58, %60 : vector<4x512xi32>
      %cst_21 = arith.constant 0.000000e+00 : f32
      %62 = vector.broadcast %cst_21 : f32 to vector<4x512xf32>
      %63 = arith.select %61, %38, %62 : vector<4x512xi1>, vector<4x512xf32>
      %64 = arith.addf %59, %63 : vector<4x512xf32>
      %c0_22 = arith.constant 0 : index
      %c0_23 = arith.constant 0 : index
      %65 = vector.load %arg5[%c0_22, %c0_23] : memref<4x512xf32, #tpu.memory_space<vmem>>, vector<4x512xf32>
      tpu.vector_store %arg5[%c0_22, %c0_23], %64 {strides = array<i32>} : memref<4x512xf32, #tpu.memory_space<vmem>>, vector<4x512xf32>,
    } else {
    }
    %c0_i32_16 = arith.constant 0 : i32
    %49 = arith.cmpi eq, %arg1, %c0_i32_16 : i32
    %50 = arith.extui %49 : i1 to i32
    %c0_i32_17 = arith.constant 0 : i32
    %51 = arith.cmpi ne, %50, %c0_i32_17 : i32
    scf.if %51 {
      %cst_18 = arith.constant 0.000000e+00 : f32
      %52 = vector.broadcast %cst_18 : f32 to vector<1x1x1xf32>
      %c0_19 = arith.constant 0 : index
      %c0_20 = arith.constant 0 : index
      %53 = vector.load %arg5[%c0_19, %c0_20] : memref<4x512xf32, #tpu.memory_space<vmem>>, vector<4x512xf32>
      %54 = vector.shape_cast %53 : vector<4x512xf32> to vector<1x4x512xf32>
      %cst_21 = arith.constant dense<0.000000e+00> : vector<1xf32>
      %55 = vector.multi_reduction <add>, %54, %cst_21 [1, 2] : vector<1x4x512xf32> to vector<1xf32>
      %56 = vector.shape_cast %55 : vector<1xf32> to vector<1x1x1xf32>
      %57 = vector.extract %56[0, 0, 0] : f32 from vector<1x1x1xf32>
      %58 = vector.broadcast %57 : f32 to vector<1x1x1xf32>
      %59 = arith.addf %52, %58 : vector<1x1x1xf32>
      %c0_22 = arith.constant 0 : index
      %c0_23 = arith.constant 0 : index
      %c0_24 = arith.constant 0 : index
      %60 = vector.load %arg4[%c0_22, %c0_23, %c0_24] : memref<1x1x1xf32, #tpu.memory_space<vmem>>, vector<1x1x1xf32>
      tpu.vector_store %arg4[%c0_22, %c0_23, %c0_24], %59 {strides = array<i32>} : memref<1x1x1xf32, #tpu.memory_space<vmem>>, vector<1x1x1xf32>,
    } else {
    }
    return
  }
  func.func @transform_0(%arg0: i32, %arg1: i32) -> (i32, i32) {
    %c1_i32 = arith.constant 1 : i32
    %0 = arith.muli %arg0, %c1_i32 : i32
    %1 = arith.addi %0, %arg1 : i32
    %c0_i32 = arith.constant 0 : i32
    %2 = arith.minsi %1, %c0_i32 : i32
    %c0_i32_0 = arith.constant 0 : i32
    %c0_i32_1 = arith.constant 0 : i32
    return %2, %c0_i32_0 : i32, i32
  }
  func.func @transform_1(%arg0: i32, %arg1: i32) -> (i32, i32) {
    %c1_i32 = arith.constant 1 : i32
    %0 = arith.muli %arg0, %c1_i32 : i32
    %1 = arith.addi %0, %arg1 : i32
    %c0_i32 = arith.constant 0 : i32
    %2 = arith.minsi %1, %c0_i32 : i32
    %c0_i32_0 = arith.constant 0 : i32
    %c0_i32_1 = arith.constant 0 : i32
    return %2, %c0_i32_0 : i32, i32
  }
  func.func @transform_2(%arg0: i32, %arg1: i32) -> (i32, i32, i32) {
    %c0_i32 = arith.constant 0 : i32
    %c0_i32_0 = arith.constant 0 : i32
    %c0_i32_1 = arith.constant 0 : i32
    return %arg0, %c0_i32, %c0_i32_0 : i32, i32, i32
  }
}

</mosaic_0001>

<bundles_post_ra>
// kernel: tpu_custom_call.1
= control target key start
LH: loop header
LB: loop body
LE: loop exit
PB: predicated region body
PF: predicated region fallthrough
CT: control target
= control target key end

     0   :  { %7 = vsyncpa [#allocation4], 0  ;;  %s339_s0 = inlined_call_operand.hbm [shape: f32[4,512], index: 0, kind: input, shape index: {}]   ;;  %s340_s1 = inlined_call_operand.hbm [shape: f32[4,512], index: 1, kind: input, shape index: {}]   ;;  %s341_s2 = inlined_call_operand.hbm [shape: f32[1,1,1], index: 2, kind: output, shape index: {}]  }
   0x1   :  { %8 = vsyncpa [#allocation7], 0 }
   0x2   :  { %9 = vsyncpa [#allocation5], 0  ;;  %s312_s9 = smov [#allocation3]   ;;  %s313_s11 = smov [#allocation6]  }
   0x3   :  { %s22_s10 = sshll.u32 %s312_s9, 4  ;;  %s38_s12 = sshll.u32 %s313_s11, 4  ;;  %s23_s10 = int_to_ptr.vmem [resolvable:$true] %s22_s10  ;;  %s39_s12 = int_to_ptr.vmem [resolvable:$true] %s38_s12 }
   0x4   :  { %s254_s13 = scalar_lea.vmem %s23_s10, 256  ;;  %p259_p1 = scmp.lt.s32.totalorder %s23_s10, %s23_s10 }
   0x5   :  { %p255_p0 = scmp.ne.s32.totalorder %s23_s10, %s254_s13  ;;  %p260_p2 = scmp.lt.s32.totalorder %s254_s13, %s254_s13 }
   0x7   :  { %p261_p3 = por %p260_p2, %p259_p1 }
   0x9   :  { %p262_p4 = pnand %p261_p3, %p255_p0 }
   0xb   :  { %265 = shalt.err (!%p262_p4)
}
   0xc   :  { %25 = dma.hbm_to_vmem [thread:$0]  %s339_s0, 256, %s23_s10, [#allocation4]  }
   0xd   :  { %s274_s16 = scalar_lea.vmem %s39_s12, 256  ;;  %p279_p6 = scmp.lt.s32.totalorder %s39_s12, %s39_s12 }
   0xe   :  { %p275_p5 = scmp.ne.s32.totalorder %s39_s12, %s274_s16  ;;  %p280_p7 = scmp.lt.s32.totalorder %s274_s16, %s274_s16 }
  0x10   :  { %p281_p8 = por %p280_p7, %p279_p6 }
  0x12   :  { %p282_p9 = pnand %p281_p8, %p275_p5 }
  0x14   :  { %285 = shalt.err (!%p282_p9)
}
  0x15   :  { %41 = dma.hbm_to_vmem [thread:$0]  %s340_s1, 256, %s39_s12, [#allocation7]  }
  0x16   :  { %306 = dma.done.wait [#allocation4], 256  }
  0x17   :  { %307 = vsyncadd [#allocation4], 4294967040 }
  0x18   :  { %308 = dma.done.wait [#allocation7], 256  }
  0x19   :  { %309 = vsyncadd [#allocation7], 4294967040  ;;  %v60_v0 = vld [vmem:[#allocation3] sm:$0xff]  ;;  %v61_v1 = vld [vmem:[#allocation3 + $0x8] sm:$0xff]  ;;  %vm188_vm2 = vcmask 1043456   ;;  %s314_s0 = smov [#allocation8]  }
  0x1a   :  { %v64_v2 = vand.u32 2147483647, %v60_v0  ;;  %v65_v3 = vand.u32 2147483647, %v61_v1  ;;  %v62_v22 = vld [vmem:[#allocation6] sm:$0xff]  ;;  %v63_v24 = vld [vmem:[#allocation6 + $0x8] sm:$0xff] }
  0x1b   :  { %vm90_vm0 = vcmp.ge.f32.partialorder %v60_v0, 0.0  ;;  %v98_v28 = vsub.f32 1.0, %v62_v22  ;;  %vm91_vm1 = vcmp.ge.f32.partialorder %v61_v1, 0.0  ;;  %v99_v30 = vsub.f32 1.0, %v63_v24  ;;  %s215_s1 = sshll.u32 %s314_s0, 4  ;;  %s216_s1 = int_to_ptr.vmem [resolvable:$true] %s215_s1 }
  0x1c   :  { %v66_v4 = vsub.f32 0.0, %v64_v2  ;;  %v67_v5 = vsub.f32 0.0, %v65_v3  ;;  %vm207_vm3 = vcmask 0   ;;  %s286_s20 = scalar_lea.vmem %s216_s1, 16  ;;  %s290_s21 = scalar_lea.vmem %s216_s1, 32 }
  0x1d   :  { %p287_p10 = scmp.ne.s32.totalorder %s216_s1, %s286_s20  ;;  %p291_p11 = scmp.lt.s32.totalorder %s216_s1, %s216_s1 }
  0x1e   :  { %v68_v6 = vmul.f32 1.442695, %v66_v4  ;;  %v70_v7 = vmul.f32 1.442695, %v67_v5  ;;  %p292_p12 = scmp.lt.s32.totalorder %s290_s21, %s286_s20 }
  0x20   :  { %234 = vpow2.f32 %v68_v6  ;;  %p293_p13 = por %p292_p12, %p291_p11 }
  0x21   :  { %236 = vpow2.f32 %v70_v7 }
  0x22   :  { %p294_p0 = pnand %p293_p13, %p287_p10 }
  0x2d   :  { %v235_v8 = vpop.eup %234 }
  0x2e   :  { %v237_v9 = vpop.eup %236  ;;  %v72_v10 = vadd.f32 1.0, %v235_v8 }
  0x2f   :  { %v73_v11 = vadd.f32 1.0, %v237_v9 }
  0x30   :  { %238 = vrcp.f32 %v72_v10 }
  0x31   :  { %240 = vrcp.f32 %v73_v11 }
  0x3d   :  { %v239_v12 = vpop.eup %238 }
  0x3e   :  { %v241_v13 = vpop.eup %240  ;;  %v76_v14 = vmul.f32 %v239_v12, %v72_v10 }
  0x3f   :  { %v77_v15 = vmul.f32 %v241_v13, %v73_v11 }
  0x40   :  { %v78_v16 = vsub.f32 2.0, %v76_v14 }
  0x41   :  { %v79_v17 = vsub.f32 2.0, %v77_v15 }
  0x42   :  { %v80_v18 = vmul.f32 %v239_v12, %v78_v16 }
  0x43   :  { %v81_v19 = vmul.f32 %v241_v13, %v79_v17 }
  0x44   :  { %v82_v20 = vmul.f32 %v80_v18, %v72_v10 }
  0x45   :  { %v83_v21 = vmul.f32 %v81_v19, %v73_v11 }
  0x46   :  { %v84_v23 = vsub.f32 2.0, %v82_v20 }
  0x47   :  { %v85_v25 = vsub.f32 2.0, %v83_v21 }
  0x48   :  { %v86_v26 = vmul.f32 %v84_v23, %v80_v18 }
  0x49   :  { %v87_v27 = vmul.f32 %v85_v25, %v81_v19 }
  0x4a   :  { %v88_v29 = vmul.f32 %v235_v8, %v86_v26 }
  0x4b   :  { %v89_v31 = vmul.f32 %v237_v9, %v87_v27 }
  0x4c   :  { %v92_v32 = vsel %vm90_vm0, %v86_v26, %v88_v29  ;;  %v94_v33 = vsel %vm90_vm0, %v88_v29, %v86_v26 }
  0x4d   :  { %v93_v34 = vsel %vm91_vm1, %v87_v27, %v89_v31  ;;  %v95_v35 = vsel %vm91_vm1, %v89_v31, %v87_v27  ;;  %v96_v36 = vmul.f32 %v92_v32, %v62_v22  ;;  %v100_v37 = vmul.f32 %v98_v28, %v94_v33 }
  0x4e   :  { %v97_v38 = vmul.f32 %v93_v34, %v63_v24  ;;  %v101_v39 = vmul.f32 %v99_v30, %v95_v35 }
  0x4f   :  { %v102_v40 = vadd.f32 %v100_v37, %v96_v36 }
  0x50   :  { %v103_v41 = vadd.f32 %v101_v39, %v97_v38 }
  0x51   :  { %v104_v42 = vadd.f32 1e-05, %v102_v40  ;;  %v110_v44 = vsub.f32 1.0, %v102_v40 }
  0x52   :  { %v105_v43 = vadd.f32 1e-05, %v103_v41  ;;  %v111_v45 = vsub.f32 1.0, %v103_v41 }
  0x53   :  { %242 = vlog2.f32 %v104_v42  ;;  %v112_v46 = vmul.f32 %v110_v44, %v110_v44 }
  0x54   :  { %244 = vlog2.f32 %v105_v43  ;;  %v113_v47 = vmul.f32 %v111_v45, %v111_v45 }
  0x55   :  { %v114_v48 = vmul.f32 -0.25, %v112_v46 }
  0x56   :  { %v115_v50 = vmul.f32 -0.25, %v113_v47 }
  0x60   :  { %v243_v49 = vpop.eup %242 }
  0x61   :  { %v245_v51 = vpop.eup %244  ;;  %v107_v52 = vmul.f32 0.6931472, %v243_v49 }
  0x62   :  { %v109_v53 = vmul.f32 0.6931472, %v245_v51 }
  0x63   :  { %v116_v54 = vmul.f32 %v114_v48, %v107_v52 }
  0x64   :  { %v117_v55 = vmul.f32 %v115_v50, %v109_v53 }
  0x65   :  { %v184_v56 = vcombine.high %v116_v54, %v116_v54  ;;  %v189_v57 = vsel %vm188_vm2, %v116_v54, 0.0 }
  0x66   :  { %v185_v58 = vcombine.high %v117_v55, %v117_v55  ;;  %v192_v60 = vsel %vm188_vm2, %v117_v55, 0.0 }
  0x67   :  { %v190_v59 = vsel %vm188_vm2, %v184_v56, 0.0 }
  0x68   :  { %v191_v61 = vadd.f32 %v190_v59, %v189_v57  ;;  %v194_v62 = vsel %vm188_vm2, %v185_v58, 0.0 }
  0x6a   :  { %v193_v63 = vadd.f32 %v192_v60, %v191_v61 }
  0x6c   :  { %v195_v0 = vadd.f32 %v194_v62, %v193_v63 }
  0x6e   :  { %196 = vadd.xlane.f32.xlu0 %v195_v0 }
  0xf7   :  { %v197_v1 = vpop.xlane.xlu0 %196 }
  0xf8   :  { %v198_v2 = vrot.slane %v197_v1, 4 }
  0xfa   :  { %v199_v3 = vadd.f32 %v198_v2, %v197_v1 }
  0xfc   :  { %v200_v4 = vrot.slane %v199_v3, 2 }
  0xfe   :  { %v201_v5 = vadd.f32 %v200_v4, %v199_v3 }
 0x100   :  { %v202_v6 = vrot.slane %v201_v5, 1 }
 0x102   :  { %v203_v7 = vadd.f32 %v202_v6, %v201_v5 }
 0x104   :  { %229 = vpush %v203_v7 }
 0x135   :  { %s230_s19 = spop %229 }
 0x136   :  { %v205_v8 = vstv %s230_s19 }
 0x137   :  { %208 = vst.msk [vmem:[#allocation8] sm:$0x1] %vm207_vm3, %v205_v8 }
 0x138   :  { %297 = shalt.err (!%p294_p0)
}
 0x139   :  { %218 = dma.vmem_to_hbm [thread:$0]  %s216_s1, 16, %s341_s2, [#allocation5]  }
 0x13a   :  { %310 = dma.done.wait [#allocation5], 16  }
 0x13b   :  { %311 = vsyncadd [#allocation5], 4294967280 }
 0x13c   :  { %222 = vsyncpa [#allocation4], 1 }
 0x13d   :  { %223 = vsyncpa [#allocation7], 1 }
 0x13e   :  { %224 = vsyncpa [#allocation5], 1 }

</bundles_post_ra>
